<compile_context>
chip_gen: v7x
topology: tpu7x:2x2x1
jax: 0.10.0
libtpu: 0.0.40
codegen_flags: <defaults>
</compile_context>

<pallas_src>
import math

import jax
import jax.numpy as jnp
from jax.experimental import pallas as pl
from jax.experimental.pallas import tpu as pltpu

# ------------------------- model configuration -------------------------
VOCAB = 32
SEQ = 8
EMBED = 32          # TransformerModel.embed_dim
HEADS = 2
HEAD_DIM = EMBED // HEADS
FFN = 64
BATCH = 2
LN_EPS = 1e-5

# rows of the packed (7, EMBED) bias/scale table
_BO, _LN1_G, _LN1_B, _B2, _LN2_G, _LN2_B, _BR1 = range(7)


def _layer_norm(x, gamma, beta):
    mu = jnp.mean(x, axis=-1, keepdims=True)
    var = jnp.mean((x - mu) ** 2, axis=-1, keepdims=True)
    return (x - mu) * jax.lax.rsqrt(var + LN_EPS) * gamma + beta


# --------------------------- fused kernel -------------------------------
def fused_kernel(ids_ref, mask_ref, tok_ref, pos_ref,
                 wqkv_ref, bqkv_ref, wo_ref, ev_ref,
                 w1_ref, b1_ref, w2_ref,
                 wr1_ref, wr2_ref, br2_ref,
                 out_ref):
    B, _, S = mask_ref.shape
    V, E = tok_ref.shape
    BS = B * S
    D = E // HEADS

    # unpack the packed (7, E) bias/scale table (static sublane slices)
    ev = ev_ref[...]
    bo    = ev[_BO:_BO + 1, :]
    ln1_g = ev[_LN1_G:_LN1_G + 1, :]
    ln1_b = ev[_LN1_B:_LN1_B + 1, :]
    b2    = ev[_B2:_B2 + 1, :]
    ln2_g = ev[_LN2_G:_LN2_G + 1, :]
    ln2_b = ev[_LN2_B:_LN2_B + 1, :]
    br1   = ev[_BR1:_BR1 + 1, :]

    # --- embedding lookup: one-hot matmul keeps the "gather" on the MXU ---
    ids = ids_ref[...]                                        # (BS, 1) int32
    iota = jax.lax.broadcasted_iota(jnp.int32, (BS, V), 1)
    one_hot = (iota == ids).astype(jnp.float32)               # (BS, V)
    x = jnp.dot(one_hot, tok_ref[...], preferred_element_type=jnp.float32)
    x = (x.reshape(B, S, E) + pos_ref[...][None, :, :]).reshape(BS, E)

    # --- fused QKV projection ---
    qkv = (jnp.dot(x, wqkv_ref[...], preferred_element_type=jnp.float32)
           + bqkv_ref[...])                                   # (BS, 3E)
    scale = 1.0 / math.sqrt(D)
    q = (qkv[:, 0:E] * scale).reshape(B, S, E)
    k = qkv[:, E:2 * E].reshape(B, S, E)
    v = qkv[:, 2 * E:3 * E].reshape(B, S, E)

    # additive key-padding bias (0 = attend, -1e9 = masked); kept (B,1,S) and
    # broadcast lazily inside the add.
    bias = (mask_ref[...] - 1.0) * 1e9                        # (B, 1, S)

    # --- multi-head self-attention, batched over B, static unroll over heads ---
    # TODO(synk): fully-masked query rows give a uniform distribution instead of
    # PyTorch's NaN for an all-padded key row (not hit by these inputs).
    wo = wo_ref[...]
    attn = jnp.zeros((BS, E), jnp.float32)
    for h in range(HEADS):
        sl = slice(h * D, (h + 1) * D)
        qh, kh, vh = q[:, :, sl], k[:, :, sl], v[:, :, sl]
        s = jnp.einsum('bqd,bkd->bqk', qh, kh,
                       preferred_element_type=jnp.float32) + bias
        s = s - jnp.max(s, axis=-1, keepdims=True)
        p = jnp.exp(s)
        p = p / jnp.sum(p, axis=-1, keepdims=True)
        ctx = jnp.einsum('bqk,bkd->bqd', p, vh,
                         preferred_element_type=jnp.float32)  # (B, S, D)
        # concat(heads) @ Wo == sum_h ctx_h @ Wo[h*D:(h+1)*D, :]
        attn = attn + jnp.dot(ctx.reshape(BS, D), wo[sl, :],
                              preferred_element_type=jnp.float32)
    attn = attn + bo

    x1 = _layer_norm(x + attn, ln1_g, ln1_b)

    # --- feed-forward ---
    hid = jnp.maximum(
        jnp.dot(x1, w1_ref[...], preferred_element_type=jnp.float32) + b1_ref[...],
        0.0)
    ffn = jnp.dot(hid, w2_ref[...], preferred_element_type=jnp.float32) + b2
    x2 = _layer_norm(x1 + ffn, ln2_g, ln2_b)

    # --- mean pool over sequence + regression head (dropout = identity at inference) ---
    pooled = jnp.mean(x2.reshape(B, S, E), axis=1)            # (B, E)
    z = jnp.maximum(
        jnp.dot(pooled, wr1_ref[...], preferred_element_type=jnp.float32) + br1,
        0.0)
    out_ref[...] = (jnp.dot(z, wr2_ref[...], preferred_element_type=jnp.float32)
                    + br2_ref[...])


# ------------------------------ wrapper ---------------------------------
@jax.jit
def downstream_regression(input_ids, attention_mask, params):
    B, S = input_ids.shape
    ids = input_ids.reshape(B * S, 1).astype(jnp.int32)
    mask = attention_mask.astype(jnp.float32).reshape(B, 1, S)
    return pl.pallas_call(
        fused_kernel,
        out_shape=jax.ShapeDtypeStruct((B, 1), jnp.float32),
        compiler_params=pltpu.CompilerParams(vmem_limit_bytes=4 * 1024 * 1024),
    )(ids, mask,
      params["tok_emb"], params["pos_emb"],
      params["wqkv"], params["bqkv"], params["wo"], params["evec"],
      params["w1"], params["b1"], params["w2"],
      params["wr1"], params["wr2"], params["br2"])


# ------------------------------ params ----------------------------------
def init_params(key):
    ks = jax.random.split(key, 10)
    n = lambda k, shape, scale: (scale * jax.random.normal(k, shape)).astype(jnp.float32)
    inv_e = 1.0 / math.sqrt(EMBED)
    inv_f = 1.0 / math.sqrt(FFN)
    wq = n(ks[2], (EMBED, EMBED), inv_e)
    wk = n(ks[3], (EMBED, EMBED), inv_e)
    wv = n(ks[4], (EMBED, EMBED), inv_e)
    zeros_e = jnp.zeros((EMBED,), jnp.float32)
    ones_e = jnp.ones((EMBED,), jnp.float32)
    # packed bias/scale table: rows = [bo, ln1_g, ln1_b, b2, ln2_g, ln2_b, br1]
    evec = jnp.stack([zeros_e, ones_e, zeros_e, zeros_e, ones_e, zeros_e, zeros_e],
                     axis=0)
    return {
        "tok_emb": n(ks[0], (VOCAB, EMBED), 0.02),
        "pos_emb": n(ks[1], (SEQ, EMBED), 0.02),
        "wqkv": jnp.concatenate([wq, wk, wv], axis=1),        # (E, 3E)
        "bqkv": jnp.zeros((1, 3 * EMBED), jnp.float32),
        "wo": n(ks[5], (EMBED, EMBED), inv_e),
        "evec": evec,                                         # (7, E)
        "w1": n(ks[6], (EMBED, FFN), inv_e),
        "b1": jnp.zeros((1, FFN), jnp.float32),
        "w2": n(ks[7], (FFN, EMBED), inv_f),
        "wr1": n(ks[8], (EMBED, EMBED), inv_e),
        "wr2": n(ks[9], (EMBED, 1), inv_e),
        "br2": jnp.zeros((1, 1), jnp.float32),
    }


if __name__ == "__main__":
    key = jax.random.PRNGKey(0)
    k_param, k_ids = jax.random.split(key)
    params = init_params(k_param)

    input_ids = jax.random.randint(k_ids, (BATCH, SEQ), 0, VOCAB, dtype=jnp.int32)
    attention_mask = jnp.array(
        [[1, 1, 1, 1, 1, 1, 1, 1],
         [1, 1, 1, 1, 1, 0, 0, 0]], dtype=jnp.int32)

    out = downstream_regression(input_ids, attention_mask, params)
    out = jax.block_until_ready(out)
    assert out.shape == (BATCH, 1) and out.dtype == jnp.float32
    assert bool(jnp.all(jnp.isfinite(out)))
    print("KERNEL_OK")
</pallas_src>

<mosaic_0001>
module attributes {stable_mosaic.version = 11 : i64} {
  func.func @fused_kernel(%arg0: memref<16x1xi32, #tpu.memory_space<vmem>>, %arg1: memref<2x1x8xf32, #tpu.memory_space<vmem>>, %arg2: memref<32x32xf32, #tpu.memory_space<vmem>>, %arg3: memref<8x32xf32, #tpu.memory_space<vmem>>, %arg4: memref<32x96xf32, #tpu.memory_space<vmem>>, %arg5: memref<1x96xf32, #tpu.memory_space<vmem>>, %arg6: memref<32x32xf32, #tpu.memory_space<vmem>>, %arg7: memref<7x32xf32, #tpu.memory_space<vmem>>, %arg8: memref<32x64xf32, #tpu.memory_space<vmem>>, %arg9: memref<1x64xf32, #tpu.memory_space<vmem>>, %arg10: memref<64x32xf32, #tpu.memory_space<vmem>>, %arg11: memref<32x32xf32, #tpu.memory_space<vmem>>, %arg12: memref<32x1xf32, #tpu.memory_space<vmem>>, %arg13: memref<1x1xf32, #tpu.memory_space<vmem>>, %arg14: memref<2x1xf32, #tpu.memory_space<vmem>>) attributes {dimension_semantics = [], scalar_prefetch = 0 : i64, scratch_operands = 0 : i64, tpu.core_type = #tpu.core_type<tc>} {
    %c0 = arith.constant 0 : index
    %c0_0 = arith.constant 0 : index
    %0 = vector.load %arg7[%c0, %c0_0] : memref<7x32xf32, #tpu.memory_space<vmem>>, vector<7x32xf32>
    %1 = vector.extract_strided_slice %0 {offsets = [0, 0], sizes = [1, 32], strides = [1, 1]} : vector<7x32xf32> to vector<1x32xf32>
    %2 = vector.extract_strided_slice %0 {offsets = [1, 0], sizes = [1, 32], strides = [1, 1]} : vector<7x32xf32> to vector<1x32xf32>
    %3 = vector.extract_strided_slice %0 {offsets = [2, 0], sizes = [1, 32], strides = [1, 1]} : vector<7x32xf32> to vector<1x32xf32>
    %4 = vector.extract_strided_slice %0 {offsets = [3, 0], sizes = [1, 32], strides = [1, 1]} : vector<7x32xf32> to vector<1x32xf32>
    %5 = vector.extract_strided_slice %0 {offsets = [4, 0], sizes = [1, 32], strides = [1, 1]} : vector<7x32xf32> to vector<1x32xf32>
    %6 = vector.extract_strided_slice %0 {offsets = [5, 0], sizes = [1, 32], strides = [1, 1]} : vector<7x32xf32> to vector<1x32xf32>
    %7 = vector.extract_strided_slice %0 {offsets = [6, 0], sizes = [1, 32], strides = [1, 1]} : vector<7x32xf32> to vector<1x32xf32>
    %c0_1 = arith.constant 0 : index
    %c0_2 = arith.constant 0 : index
    %8 = vector.load %arg0[%c0_1, %c0_2] : memref<16x1xi32, #tpu.memory_space<vmem>>, vector<16x1xi32>
    %9 = tpu.iota {dimensions = array<i32: 1>} : vector<16x32xi32>
    %10 = vector.broadcast %8 : vector<16x1xi32> to vector<16x32xi32>
    %11 = arith.cmpi eq, %9, %10 : vector<16x32xi32>
    %12 = arith.extui %11 : vector<16x32xi1> to vector<16x32xi32>
    %13 = arith.sitofp %12 : vector<16x32xi32> to vector<16x32xf32>
    %c0_3 = arith.constant 0 : index
    %c0_4 = arith.constant 0 : index
    %14 = vector.load %arg2[%c0_3, %c0_4] : memref<32x32xf32, #tpu.memory_space<vmem>>, vector<32x32xf32>
    %cst = arith.constant dense<0.000000e+00> : vector<16x32xf32>
    %15 = tpu.matmul %13, %14, %cst {dimension_numbers = #tpu.dot_dimension_numbers<[1], [0], [0], [1], [0, 0, 1, 1], [], []>} : vector<16x32xf32>, vector<32x32xf32>, vector<16x32xf32> -> vector<16x32xf32>
    %16 = vector.shape_cast %15 : vector<16x32xf32> to vector<2x8x32xf32>
    %c0_5 = arith.constant 0 : index
    %c0_6 = arith.constant 0 : index
    %17 = vector.load %arg3[%c0_5, %c0_6] : memref<8x32xf32, #tpu.memory_space<vmem>>, vector<8x32xf32>
    %18 = vector.shape_cast %17 : vector<8x32xf32> to vector<1x8x32xf32>
    %19 = vector.broadcast %18 : vector<1x8x32xf32> to vector<2x8x32xf32>
    %20 = arith.addf %16, %19 : vector<2x8x32xf32>
    %21 = vector.shape_cast %20 : vector<2x8x32xf32> to vector<16x32xf32>
    %c0_7 = arith.constant 0 : index
    %c0_8 = arith.constant 0 : index
    %22 = vector.load %arg4[%c0_7, %c0_8] : memref<32x96xf32, #tpu.memory_space<vmem>>, vector<32x96xf32>
    %cst_9 = arith.constant dense<0.000000e+00> : vector<16x96xf32>
    %23 = tpu.matmul %21, %22, %cst_9 {dimension_numbers = #tpu.dot_dimension_numbers<[1], [0], [0], [1], [0, 0, 1, 1], [], []>} : vector<16x32xf32>, vector<32x96xf32>, vector<16x96xf32> -> vector<16x96xf32>
    %c0_10 = arith.constant 0 : index
    %c0_11 = arith.constant 0 : index
    %24 = vector.load %arg5[%c0_10, %c0_11] : memref<1x96xf32, #tpu.memory_space<vmem>>, vector<1x96xf32>
    %25 = vector.broadcast %24 : vector<1x96xf32> to vector<16x96xf32>
    %26 = arith.addf %23, %25 : vector<16x96xf32>
    %27 = vector.extract_strided_slice %26 {offsets = [0, 0], sizes = [16, 32], strides = [1, 1]} : vector<16x96xf32> to vector<16x32xf32>
    %cst_12 = arith.constant 2.500000e-01 : f32
    %28 = vector.broadcast %cst_12 : f32 to vector<16x32xf32>
    %29 = arith.mulf %27, %28 : vector<16x32xf32>
    %30 = vector.shape_cast %29 : vector<16x32xf32> to vector<2x8x32xf32>
    %31 = vector.extract_strided_slice %26 {offsets = [0, 32], sizes = [16, 32], strides = [1, 1]} : vector<16x96xf32> to vector<16x32xf32>
    %32 = vector.shape_cast %31 : vector<16x32xf32> to vector<2x8x32xf32>
    %33 = vector.extract_strided_slice %26 {offsets = [0, 64], sizes = [16, 32], strides = [1, 1]} : vector<16x96xf32> to vector<16x32xf32>
    %34 = vector.shape_cast %33 : vector<16x32xf32> to vector<2x8x32xf32>
    %c0_13 = arith.constant 0 : index
    %c0_14 = arith.constant 0 : index
    %c0_15 = arith.constant 0 : index
    %35 = vector.load %arg1[%c0_13, %c0_14, %c0_15] : memref<2x1x8xf32, #tpu.memory_space<vmem>>, vector<2x1x8xf32>
    %cst_16 = arith.constant 1.000000e+00 : f32
    %36 = vector.broadcast %cst_16 : f32 to vector<2x1x8xf32>
    %37 = arith.subf %35, %36 : vector<2x1x8xf32>
    %cst_17 = arith.constant 1.000000e+09 : f32
    %38 = vector.broadcast %cst_17 : f32 to vector<2x1x8xf32>
    %39 = arith.mulf %37, %38 : vector<2x1x8xf32>
    %c0_18 = arith.constant 0 : index
    %c0_19 = arith.constant 0 : index
    %40 = vector.load %arg6[%c0_18, %c0_19] : memref<32x32xf32, #tpu.memory_space<vmem>>, vector<32x32xf32>
    %cst_20 = arith.constant 0.000000e+00 : f32
    %41 = vector.broadcast %cst_20 : f32 to vector<16x32xf32>
    %42 = vector.extract_strided_slice %30 {offsets = [0, 0, 0], sizes = [2, 8, 16], strides = [1, 1, 1]} : vector<2x8x32xf32> to vector<2x8x16xf32>
    %43 = vector.extract_strided_slice %32 {offsets = [0, 0, 0], sizes = [2, 8, 16], strides = [1, 1, 1]} : vector<2x8x32xf32> to vector<2x8x16xf32>
    %44 = vector.extract_strided_slice %34 {offsets = [0, 0, 0], sizes = [2, 8, 16], strides = [1, 1, 1]} : vector<2x8x32xf32> to vector<2x8x16xf32>
    "tpu.trace_start"() <{level = 10 : i32, message = "bqd,bkd->bqk"}> : () -> ()
    %cst_21 = arith.constant dense<0.000000e+00> : vector<2x8x8xf32>
    %45 = tpu.matmul %42, %43, %cst_21 {dimension_numbers = #tpu.dot_dimension_numbers<[2], [2], [1], [1], [0, 0, 0, 1, 1, 1], [0], [0]>} : vector<2x8x16xf32>, vector<2x8x16xf32>, vector<2x8x8xf32> -> vector<2x8x8xf32>
    "tpu.trace_stop"() : () -> ()
    %46 = vector.broadcast %39 : vector<2x1x8xf32> to vector<2x8x8xf32>
    %47 = arith.addf %45, %46 : vector<2x8x8xf32>
    %cst_22 = arith.constant dense<0xFF800000> : vector<2x8xf32>
    %48 = vector.multi_reduction <maximumf>, %47, %cst_22 [2] : vector<2x8x8xf32> to vector<2x8xf32>
    %49 = vector.shape_cast %48 : vector<2x8xf32> to vector<2x8x1xf32>
    %50 = vector.broadcast %49 : vector<2x8x1xf32> to vector<2x8x8xf32>
    %51 = arith.subf %47, %50 : vector<2x8x8xf32>
    %52 = math.exp %51 : vector<2x8x8xf32>
    %cst_23 = arith.constant dense<0.000000e+00> : vector<2x8xf32>
    %53 = vector.multi_reduction <add>, %52, %cst_23 [2] : vector<2x8x8xf32> to vector<2x8xf32>
    %54 = vector.shape_cast %53 : vector<2x8xf32> to vector<2x8x1xf32>
    %55 = vector.broadcast %54 : vector<2x8x1xf32> to vector<2x8x8xf32>
    %56 = arith.divf %52, %55 : vector<2x8x8xf32>
    "tpu.trace_start"() <{level = 10 : i32, message = "bqk,bkd->bqd"}> : () -> ()
    %cst_24 = arith.constant dense<0.000000e+00> : vector<2x8x16xf32>
    %57 = tpu.matmul %56, %44, %cst_24 {dimension_numbers = #tpu.dot_dimension_numbers<[2], [1], [1], [2], [0, 0, 0, 1, 1, 2], [0], [0]>} : vector<2x8x8xf32>, vector<2x8x16xf32>, vector<2x8x16xf32> -> vector<2x8x16xf32>
    "tpu.trace_stop"() : () -> ()
    %58 = vector.shape_cast %57 : vector<2x8x16xf32> to vector<16x16xf32>
    %59 = vector.extract_strided_slice %40 {offsets = [0, 0], sizes = [16, 32], strides = [1, 1]} : vector<32x32xf32> to vector<16x32xf32>
    %cst_25 = arith.constant dense<0.000000e+00> : vector<16x32xf32>
    %60 = tpu.matmul %58, %59, %cst_25 {dimension_numbers = #tpu.dot_dimension_numbers<[1], [0], [0], [1], [0, 0, 1, 1], [], []>} : vector<16x16xf32>, vector<16x32xf32>, vector<16x32xf32> -> vector<16x32xf32>
    %61 = arith.addf %41, %60 : vector<16x32xf32>
    %62 = vector.extract_strided_slice %30 {offsets = [0, 0, 16], sizes = [2, 8, 16], strides = [1, 1, 1]} : vector<2x8x32xf32> to vector<2x8x16xf32>
    %63 = vector.extract_strided_slice %32 {offsets = [0, 0, 16], sizes = [2, 8, 16], strides = [1, 1, 1]} : vector<2x8x32xf32> to vector<2x8x16xf32>
    %64 = vector.extract_strided_slice %34 {offsets = [0, 0, 16], sizes = [2, 8, 16], strides = [1, 1, 1]} : vector<2x8x32xf32> to vector<2x8x16xf32>
    "tpu.trace_start"() <{level = 10 : i32, message = "bqd,bkd->bqk"}> : () -> ()
    %cst_26 = arith.constant dense<0.000000e+00> : vector<2x8x8xf32>
    %65 = tpu.matmul %62, %63, %cst_26 {dimension_numbers = #tpu.dot_dimension_numbers<[2], [2], [1], [1], [0, 0, 0, 1, 1, 1], [0], [0]>} : vector<2x8x16xf32>, vector<2x8x16xf32>, vector<2x8x8xf32> -> vector<2x8x8xf32>
    "tpu.trace_stop"() : () -> ()
    %66 = vector.broadcast %39 : vector<2x1x8xf32> to vector<2x8x8xf32>
    %67 = arith.addf %65, %66 : vector<2x8x8xf32>
    %cst_27 = arith.constant dense<0xFF800000> : vector<2x8xf32>
    %68 = vector.multi_reduction <maximumf>, %67, %cst_27 [2] : vector<2x8x8xf32> to vector<2x8xf32>
    %69 = vector.shape_cast %68 : vector<2x8xf32> to vector<2x8x1xf32>
    %70 = vector.broadcast %69 : vector<2x8x1xf32> to vector<2x8x8xf32>
    %71 = arith.subf %67, %70 : vector<2x8x8xf32>
    %72 = math.exp %71 : vector<2x8x8xf32>
    %cst_28 = arith.constant dense<0.000000e+00> : vector<2x8xf32>
    %73 = vector.multi_reduction <add>, %72, %cst_28 [2] : vector<2x8x8xf32> to vector<2x8xf32>
    %74 = vector.shape_cast %73 : vector<2x8xf32> to vector<2x8x1xf32>
    %75 = vector.broadcast %74 : vector<2x8x1xf32> to vector<2x8x8xf32>
    %76 = arith.divf %72, %75 : vector<2x8x8xf32>
    "tpu.trace_start"() <{level = 10 : i32, message = "bqk,bkd->bqd"}> : () -> ()
    %cst_29 = arith.constant dense<0.000000e+00> : vector<2x8x16xf32>
    %77 = tpu.matmul %76, %64, %cst_29 {dimension_numbers = #tpu.dot_dimension_numbers<[2], [1], [1], [2], [0, 0, 0, 1, 1, 2], [0], [0]>} : vector<2x8x8xf32>, vector<2x8x16xf32>, vector<2x8x16xf32> -> vector<2x8x16xf32>
    "tpu.trace_stop"() : () -> ()
    %78 = vector.shape_cast %77 : vector<2x8x16xf32> to vector<16x16xf32>
    %79 = vector.extract_strided_slice %40 {offsets = [16, 0], sizes = [16, 32], strides = [1, 1]} : vector<32x32xf32> to vector<16x32xf32>
    %cst_30 = arith.constant dense<0.000000e+00> : vector<16x32xf32>
    %80 = tpu.matmul %78, %79, %cst_30 {dimension_numbers = #tpu.dot_dimension_numbers<[1], [0], [0], [1], [0, 0, 1, 1], [], []>} : vector<16x16xf32>, vector<16x32xf32>, vector<16x32xf32> -> vector<16x32xf32>
    %81 = arith.addf %61, %80 : vector<16x32xf32>
    %82 = vector.broadcast %1 : vector<1x32xf32> to vector<16x32xf32>
    %83 = arith.addf %81, %82 : vector<16x32xf32>
    %84 = arith.addf %21, %83 : vector<16x32xf32>
    %cst_31 = arith.constant dense<0.000000e+00> : vector<16xf32>
    %85 = vector.multi_reduction <add>, %84, %cst_31 [1] : vector<16x32xf32> to vector<16xf32>
    %86 = vector.shape_cast %85 : vector<16xf32> to vector<16x1xf32>
    %cst_32 = arith.constant 3.200000e+01 : f32
    %87 = vector.broadcast %cst_32 : f32 to vector<16x1xf32>
    %88 = arith.divf %86, %87 : vector<16x1xf32>
    %89 = vector.broadcast %88 : vector<16x1xf32> to vector<16x32xf32>
    %90 = arith.subf %84, %89 : vector<16x32xf32>
    %91 = arith.mulf %90, %90 : vector<16x32xf32>
    %cst_33 = arith.constant dense<0.000000e+00> : vector<16xf32>
    %92 = vector.multi_reduction <add>, %91, %cst_33 [1] : vector<16x32xf32> to vector<16xf32>
    %93 = vector.shape_cast %92 : vector<16xf32> to vector<16x1xf32>
    %cst_34 = arith.constant 3.200000e+01 : f32
    %94 = vector.broadcast %cst_34 : f32 to vector<16x1xf32>
    %95 = arith.divf %93, %94 : vector<16x1xf32>
    %96 = vector.broadcast %88 : vector<16x1xf32> to vector<16x32xf32>
    %97 = arith.subf %84, %96 : vector<16x32xf32>
    %cst_35 = arith.constant 9.99999974E-6 : f32
    %98 = vector.broadcast %cst_35 : f32 to vector<16x1xf32>
    %99 = arith.addf %95, %98 : vector<16x1xf32>
    %100 = math.rsqrt %99 : vector<16x1xf32>
    %101 = vector.broadcast %100 : vector<16x1xf32> to vector<16x32xf32>
    %102 = arith.mulf %97, %101 : vector<16x32xf32>
    %103 = vector.broadcast %2 : vector<1x32xf32> to vector<16x32xf32>
    %104 = arith.mulf %102, %103 : vector<16x32xf32>
    %105 = vector.broadcast %3 : vector<1x32xf32> to vector<16x32xf32>
    %106 = arith.addf %104, %105 : vector<16x32xf32>
    %c0_36 = arith.constant 0 : index
    %c0_37 = arith.constant 0 : index
    %107 = vector.load %arg8[%c0_36, %c0_37] : memref<32x64xf32, #tpu.memory_space<vmem>>, vector<32x64xf32>
    %cst_38 = arith.constant dense<0.000000e+00> : vector<16x64xf32>
    %108 = tpu.matmul %106, %107, %cst_38 {dimension_numbers = #tpu.dot_dimension_numbers<[1], [0], [0], [1], [0, 0, 1, 1], [], []>} : vector<16x32xf32>, vector<32x64xf32>, vector<16x64xf32> -> vector<16x64xf32>
    %c0_39 = arith.constant 0 : index
    %c0_40 = arith.constant 0 : index
    %109 = vector.load %arg9[%c0_39, %c0_40] : memref<1x64xf32, #tpu.memory_space<vmem>>, vector<1x64xf32>
    %110 = vector.broadcast %109 : vector<1x64xf32> to vector<16x64xf32>
    %111 = arith.addf %108, %110 : vector<16x64xf32>
    %cst_41 = arith.constant 0.000000e+00 : f32
    %112 = vector.broadcast %cst_41 : f32 to vector<16x64xf32>
    %113 = arith.maximumf %111, %112 : vector<16x64xf32>
    %c0_42 = arith.constant 0 : index
    %c0_43 = arith.constant 0 : index
    %114 = vector.load %arg10[%c0_42, %c0_43] : memref<64x32xf32, #tpu.memory_space<vmem>>, vector<64x32xf32>
    %cst_44 = arith.constant dense<0.000000e+00> : vector<16x32xf32>
    %115 = tpu.matmul %113, %114, %cst_44 {dimension_numbers = #tpu.dot_dimension_numbers<[1], [0], [0], [1], [0, 0, 1, 1], [], []>} : vector<16x64xf32>, vector<64x32xf32>, vector<16x32xf32> -> vector<16x32xf32>
    %116 = vector.broadcast %4 : vector<1x32xf32> to vector<16x32xf32>
    %117 = arith.addf %115, %116 : vector<16x32xf32>
    %118 = arith.addf %106, %117 : vector<16x32xf32>
    %cst_45 = arith.constant dense<0.000000e+00> : vector<16xf32>
    %119 = vector.multi_reduction <add>, %118, %cst_45 [1] : vector<16x32xf32> to vector<16xf32>
    %120 = vector.shape_cast %119 : vector<16xf32> to vector<16x1xf32>
    %cst_46 = arith.constant 3.200000e+01 : f32
    %121 = vector.broadcast %cst_46 : f32 to vector<16x1xf32>
    %122 = arith.divf %120, %121 : vector<16x1xf32>
    %123 = vector.broadcast %122 : vector<16x1xf32> to vector<16x32xf32>
    %124 = arith.subf %118, %123 : vector<16x32xf32>
    %125 = arith.mulf %124, %124 : vector<16x32xf32>
    %cst_47 = arith.constant dense<0.000000e+00> : vector<16xf32>
    %126 = vector.multi_reduction <add>, %125, %cst_47 [1] : vector<16x32xf32> to vector<16xf32>
    %127 = vector.shape_cast %126 : vector<16xf32> to vector<16x1xf32>
    %cst_48 = arith.constant 3.200000e+01 : f32
    %128 = vector.broadcast %cst_48 : f32 to vector<16x1xf32>
    %129 = arith.divf %127, %128 : vector<16x1xf32>
    %130 = vector.broadcast %122 : vector<16x1xf32> to vector<16x32xf32>
    %131 = arith.subf %118, %130 : vector<16x32xf32>
    %cst_49 = arith.constant 9.99999974E-6 : f32
    %132 = vector.broadcast %cst_49 : f32 to vector<16x1xf32>
    %133 = arith.addf %129, %132 : vector<16x1xf32>
    %134 = math.rsqrt %133 : vector<16x1xf32>
    %135 = vector.broadcast %134 : vector<16x1xf32> to vector<16x32xf32>
    %136 = arith.mulf %131, %135 : vector<16x32xf32>
    %137 = vector.broadcast %5 : vector<1x32xf32> to vector<16x32xf32>
    %138 = arith.mulf %136, %137 : vector<16x32xf32>
    %139 = vector.broadcast %6 : vector<1x32xf32> to vector<16x32xf32>
    %140 = arith.addf %138, %139 : vector<16x32xf32>
    %141 = vector.shape_cast %140 : vector<16x32xf32> to vector<2x8x32xf32>
    %cst_50 = arith.constant dense<0.000000e+00> : vector<2x32xf32>
    %142 = vector.multi_reduction <add>, %141, %cst_50 [1] : vector<2x8x32xf32> to vector<2x32xf32>
    %cst_51 = arith.constant 8.000000e+00 : f32
    %143 = vector.broadcast %cst_51 : f32 to vector<2x32xf32>
    %144 = arith.divf %142, %143 : vector<2x32xf32>
    %c0_52 = arith.constant 0 : index
    %c0_53 = arith.constant 0 : index
    %145 = vector.load %arg11[%c0_52, %c0_53] : memref<32x32xf32, #tpu.memory_space<vmem>>, vector<32x32xf32>
    %cst_54 = arith.constant dense<0.000000e+00> : vector<2x32xf32>
    %146 = tpu.matmul %144, %145, %cst_54 {dimension_numbers = #tpu.dot_dimension_numbers<[1], [0], [0], [1], [0, 0, 1, 1], [], []>} : vector<2x32xf32>, vector<32x32xf32>, vector<2x32xf32> -> vector<2x32xf32>
    %147 = vector.broadcast %7 : vector<1x32xf32> to vector<2x32xf32>
    %148 = arith.addf %146, %147 : vector<2x32xf32>
    %cst_55 = arith.constant 0.000000e+00 : f32
    %149 = vector.broadcast %cst_55 : f32 to vector<2x32xf32>
    %150 = arith.maximumf %148, %149 : vector<2x32xf32>
    %c0_56 = arith.constant 0 : index
    %c0_57 = arith.constant 0 : index
    %151 = vector.load %arg12[%c0_56, %c0_57] : memref<32x1xf32, #tpu.memory_space<vmem>>, vector<32x1xf32>
    %cst_58 = arith.constant dense<0.000000e+00> : vector<2x1xf32>
    %152 = tpu.matmul %150, %151, %cst_58 {dimension_numbers = #tpu.dot_dimension_numbers<[1], [0], [0], [1], [0, 0, 1, 1], [], []>} : vector<2x32xf32>, vector<32x1xf32>, vector<2x1xf32> -> vector<2x1xf32>
    %c0_59 = arith.constant 0 : index
    %c0_60 = arith.constant 0 : index
    %153 = vector.load %arg13[%c0_59, %c0_60] : memref<1x1xf32, #tpu.memory_space<vmem>>, vector<1x1xf32>
    %154 = vector.broadcast %153 : vector<1x1xf32> to vector<2x1xf32>
    %155 = arith.addf %152, %154 : vector<2x1xf32>
    %c0_61 = arith.constant 0 : index
    %c0_62 = arith.constant 0 : index
    %156 = vector.load %arg14[%c0_61, %c0_62] : memref<2x1xf32, #tpu.memory_space<vmem>>, vector<2x1xf32>
    tpu.vector_store %arg14[%c0_61, %c0_62], %155 {strides = array<i32>} : memref<2x1xf32, #tpu.memory_space<vmem>>, vector<2x1xf32>,
    return
  }
}

</mosaic_0001>

<bundles_post_ra>
// kernel: downstream_regression.1
= control target key start
LH: loop header
LB: loop body
LE: loop exit
PB: predicated region body
PF: predicated region fallthrough
CT: control target
= control target key end

     0   :  { %s2404_s0 = inlined_call_operand.vmem [shape: s32[16,1], index: 0, kind: input, shape index: {}]   ;;  %s2405_s1 = inlined_call_operand.vmem [shape: f32[2,1,8], index: 1, kind: input, shape index: {}]   ;;  %s2406_s2 = inlined_call_operand.vmem [shape: f32[32,32], index: 2, kind: input, shape index: {}]   ;;  %s2407_s3 = inlined_call_operand.hbm [shape: f32[8,32], index: 3, kind: input, shape index: {}]   ;;  %s2408_s4 = inlined_call_operand.vmem [shape: f32[32,96], index: 4, kind: input, shape index: {}]   ;;  %s2409_s5 = inlined_call_operand.hbm [shape: f32[1,96], index: 5, kind: input, shape index: {}]   ;;  %s2410_s6 = inlined_call_operand.vmem [shape: f32[32,32], index: 6, kind: input, shape index: {}]   ;;  %s2411_s7 = inlined_call_operand.hbm [shape: f32[7,32], index: 7, kind: input, shape index: {}]   ;;  %s2412_s8 = inlined_call_operand.vmem [shape: f32[32,64], index: 8, kind: input, shape index: {}]   ;;  %s2413_s9 = inlined_call_operand.hbm [shape: f32[1,64], index: 9, kind: input, shape index: {}]   ;;  %s2414_s10 = inlined_call_operand.vmem [shape: f32[64,32], index: 10, kind: input, shape index: {}]   ;;  %s2415_s11 = inlined_call_operand.vmem [shape: f32[32,32], index: 11, kind: input, shape index: {}]   ;;  %s2416_s12 = inlined_call_operand.vmem [shape: f32[32,1], index: 12, kind: input, shape index: {}]   ;;  %s2417_s13 = inlined_call_operand.<no memory space> [shape: f32[1,1], index: 13, kind: input, shape index: {}]   ;;  %s2418_s14 = inlined_call_operand.vmem [shape: f32[2,1], index: 14, kind: output, shape index: {}]  }
   0x1   :  { %v19_v0 = vstv %s2417_s13 }
   0x2   :  { %20 = vst [vmem:[#allocation2] sm:$0x1] %v19_v0 }
   0x3   :  { %21 = vsyncpa [#allocation4], 0 }
   0x4   :  { %22 = vsyncpa [#allocation6], 0 }
   0x5   :  { %23 = vsyncpa [#allocation9], 0  ;;  %s2029_s15 = smov [#allocation5]   ;;  %s2030_s17 = smov [#allocation3]  }
   0x6   :  { %s48_s16 = sshll.u32 %s2029_s15, 4  ;;  %s36_s18 = sshll.u32 %s2030_s17, 4  ;;  %s49_s16 = int_to_ptr.vmem [resolvable:$true] %s48_s16  ;;  %s37_s18 = int_to_ptr.vmem [resolvable:$true] %s36_s18 }
   0x7   :  { %s1935_s21 = scalar_lea.hbm %s2409_s5, 16 }
   0x8   :  { %p1936_p0 = scmp.ne.s32.totalorder %s2409_s5, %s1935_s21  ;;  %p1939_p1 = scmp.lt.u32.totalorder %s1935_s21, %s2409_s5 }
   0xa   :  { %p1941_p2 = pnand %p1939_p1, %p1936_p0 }
   0xc   :  { %1944 = shalt.err (!%p1941_p2)
}
   0xd   :  { %s1945_s25 = scalar_lea.vmem %s49_s16, 16  ;;  %s1949_s26 = scalar_lea.vmem %s49_s16, 32 }
   0xe   :  { %p1946_p3 = scmp.ne.s32.totalorder %s49_s16, %s1945_s25  ;;  %p1950_p4 = scmp.lt.s32.totalorder %s49_s16, %s49_s16 }
   0xf   :  { %p1951_p5 = scmp.lt.s32.totalorder %s1949_s26, %s1945_s25 }
  0x11   :  { %p1952_p6 = por %p1951_p5, %p1950_p4 }
  0x13   :  { %p1953_p7 = pnand %p1952_p6, %p1946_p3 }
  0x15   :  { %1956 = shalt.err (!%p1953_p7)
}
  0x16   :  { %51 = dma.hbm_to_vmem [thread:$0]  %s2409_s5, 16, %s49_s16, [#allocation6]  }
  0x17   :  { %s1957_s15 = scalar_lea.hbm %s2407_s3, 128 }
  0x18   :  { %p1958_p8 = scmp.ne.s32.totalorder %s2407_s3, %s1957_s15  ;;  %p1961_p9 = scmp.lt.u32.totalorder %s1957_s15, %s2407_s3 }
  0x1a   :  { %p1963_p10 = pnand %p1961_p9, %p1958_p8 }
  0x1c   :  { %1966 = shalt.err (!%p1963_p10)
}
  0x1d   :  { %s1967_s22 = scalar_lea.vmem %s37_s18, 128  ;;  %p1972_p12 = scmp.lt.s32.totalorder %s37_s18, %s37_s18 }
  0x1e   :  { %p1968_p11 = scmp.ne.s32.totalorder %s37_s18, %s1967_s22  ;;  %p1973_p13 = scmp.lt.s32.totalorder %s1967_s22, %s1967_s22 }
  0x20   :  { %p1974_p0 = por %p1973_p13, %p1972_p12 }
  0x22   :  { %p1975_p1 = pnand %p1974_p0, %p1968_p11 }
  0x24   :  { %1978 = shalt.err (!%p1975_p1)
}
  0x25   :  { %39 = dma.hbm_to_vmem [thread:$0]  %s2407_s3, 128, %s37_s18, [#allocation4]  }
  0x26   :  { %s2031_s23 = smov [#allocation7]   ;;  %s2032_s13 = smov [#allocation8]  }
  0x27   :  { %s60_s24 = sshll.u32 %s2031_s23, 4  ;;  %s72_s25 = sshll.u32 %s2032_s13, 4  ;;  %s61_s24 = int_to_ptr.vmem [resolvable:$true] %s60_s24  ;;  %s73_s25 = int_to_ptr.vmem [resolvable:$true] %s72_s25 }
  0x28   :  { %s1979_s28 = scalar_lea.hbm %s2411_s7, 128 }
  0x29   :  { %p1980_p2 = scmp.ne.s32.totalorder %s2411_s7, %s1979_s28  ;;  %p1983_p3 = scmp.lt.u32.totalorder %s1979_s28, %s2411_s7 }
  0x2b   :  { %p1985_p4 = pnand %p1983_p3, %p1980_p2 }
  0x2d   :  { %1988 = shalt.err (!%p1985_p4)
}
  0x2e   :  { %s1989_s3 = scalar_lea.vmem %s61_s24, 128  ;;  %p1994_p6 = scmp.lt.s32.totalorder %s61_s24, %s61_s24 }
  0x2f   :  { %p1990_p5 = scmp.ne.s32.totalorder %s61_s24, %s1989_s3  ;;  %p1995_p7 = scmp.lt.s32.totalorder %s1989_s3, %s1989_s3 }
  0x31   :  { %p1996_p8 = por %p1995_p7, %p1994_p6 }
  0x33   :  { %p1997_p9 = pnand %p1996_p8, %p1990_p5 }
  0x35   :  { %2000 = shalt.err (!%p1997_p9)
}
  0x36   :  { %63 = dma.hbm_to_vmem [thread:$0]  %s2411_s7, 128, %s61_s24, [#allocation6]  }
  0x37   :  { %s2001_s22 = scalar_lea.hbm %s2413_s9, 16 }
  0x38   :  { %p2002_p10 = scmp.ne.s32.totalorder %s2413_s9, %s2001_s22  ;;  %p2005_p11 = scmp.lt.u32.totalorder %s2001_s22, %s2413_s9 }
  0x3a   :  { %p2007_p12 = pnand %p2005_p11, %p2002_p10 }
  0x3c   :  { %2010 = shalt.err (!%p2007_p12)
}
  0x3d   :  { %s2011_s26 = scalar_lea.vmem %s73_s25, 16  ;;  %s2015_s27 = scalar_lea.vmem %s73_s25, 32 }
  0x3e   :  { %p2012_p13 = scmp.ne.s32.totalorder %s73_s25, %s2011_s26  ;;  %p2016_p0 = scmp.lt.s32.totalorder %s73_s25, %s73_s25 }
  0x3f   :  { %p2017_p1 = scmp.lt.s32.totalorder %s2015_s27, %s2011_s26 }
  0x41   :  { %p2018_p2 = por %p2017_p1, %p2016_p0 }
  0x43   :  { %p2019_p3 = pnand %p2018_p2, %p2012_p13 }
  0x45   :  { %2022 = shalt.err (!%p2019_p3)
}
  0x46   :  { %75 = dma.hbm_to_vmem [thread:$0]  %s2413_s9, 16, %s73_s25, [#allocation9]  }
  0x47   :  { %2023 = dma.done.wait [#allocation4], 128  }
  0x48   :  { %2024 = vsyncadd [#allocation4], 4294967168 }
  0x49   :  { %2025 = dma.done.wait [#allocation6], 144  }
  0x4a   :  { %2026 = vsyncadd [#allocation6], 4294967152 }
  0x4b   :  { %2027 = dma.done.wait [#allocation9], 16  }
  0x4c   :  { %2028 = vsyncadd [#allocation9], 4294967280  ;;  %v2033_v1 = vmov 0   ;;  %v97_v2 = vld [vmem:[%s2404_s0] sm:$0xff]  ;;  %v114_v4 = vld [vmem:[%s2406_s2 + $0x8] sm:$0xff]  ;;  %v2034_v13 = vmov 0.0   ;;  %v99_v14 = vlaneseq }
  0x4d   :  { %1910 = vset.pattern.permute.xlu0 %v2033_v1  ;;  %v113_v3 = vld [vmem:[%s2406_s2] sm:$0xff]  ;;  %v115_v5 = vld [vmem:[%s2406_s2 + $0x10] sm:$0xff]  ;;  %v116_v6 = vld [vmem:[%s2406_s2 + $0x18] sm:$0xff]  ;;  %vm117_vm0 = vcmask 261120   ;;  %vm2035_vm3 = vmmov 0   ;;  %vm321_vm4 = vcmask 130048  }
  0x4e   :  { %102 = vperm.xlu0 %1910, %v97_v2   ;;  %v98_v7 = vld [vmem:[%s2404_s0 + $0x8] sm:$0xff]  ;;  %v1835_v8 = vpack.c.bf16 %v114_v4, %v113_v3  ;;  %v1839_v9 = vpack.c.bf16 %v116_v6, %v115_v5  ;;  %v202_v10 = vld [vmem:[%s2408_s4] sm:$0xff]  ;;  %v100_v15 = vand.u32 127, %v99_v14  ;;  %v204_v20 = vld [vmem:[%s2408_s4 + $0x10] sm:$0xff]  ;;  %v2237_v38 = vshrl.u32 %v99_v14, 7  ;;  %s2038_s29 = smov 80  }
  0x4f   :  { %v203_v11 = vld [vmem:[%s2408_s4 + $0x8] sm:$0xff]  ;;  %v205_v21 = vld [vmem:[%s2408_s4 + $0x18] sm:$0xff]  ;;  %s2036_s4 = smov 96   ;;  %v296_v37 = vld [vmem:[%s2405_s1] sm:$0x1]  ;;  %vm475_vm5 = vcmask 64512  }
  0x50   :  { %1836 = vmatprep.subr.bf16.mxu0 %v1835_v8  ;;  %v1843_v12 = vpack.c.bf16 %v203_v11, %v202_v10  ;;  %v1847_v22 = vpack.c.bf16 %v205_v21, %v204_v20  ;;  %v199_v23 = vld [vmem:[#allocation3] sm:$0xff]  ;;  %v1616_v28 = vld [vmem:[#allocation5] ss:$0 sm:$0xff]  ;;  %v1619_v39 = vadd.f32 -1.0, %v296_v37  ;;  %v2243_v42 = vsub.s32 0, %v2237_v38  ;;  %s2039_s30 = smov 112  }
  0x51   :  { %1838 = vmatpush3.bf16.msra.mxu0 %v1835_v8  ;;  %v297_v40 = vld [vmem:[%s2405_s1 + $0x1] sm:$0x1]  ;;  %s2037_s1 = smov 64   ;;  %s2040_s15 = smov 48   ;;  %vm1295_vm6 = vcmask 523264   ;;  %vm1444_vm7 = vcmask 1041409  }
  0x52   :  { %105 = vperm.xlu0 %1910, %v98_v7   ;;  %1840 = vmatprep.subr.bf16.mxu0 %v1839_v9  ;;  %v300_v41 = vmul.f32 1e+09, %v1619_v39  ;;  %v1620_v43 = vadd.f32 -1.0, %v297_v40  ;;  %vm1603_vm8 = vcmask 1024  }
  0x53   :  { %1844 = vmatprep.subr.bf16.mxu1 %v1843_v12 }
  0x54   :  { %1846 = vmatpush3.bf16.msra.mxu1 %v1843_v12  ;;  %v2246_v44 = vrot.slane %v300_v41, %v2243_v42  ;;  %v301_v45 = vmul.f32 1e+09, %v1620_v43 }
  0x55   :  { %1842 = vmatpush3.bf16.msra.mxu0 %v1839_v9  ;;  %1848 = vmatprep.subr.bf16.mxu1 %v1847_v22 }
  0x56   :  { %1729 = vmatprep.subr.mxu0 %v2034_v13  ;;  %v2250_v49 = vrot.slane %v301_v45, %v2243_v42 }
  0x58   :  { %1850 = vmatpush3.bf16.msra.mxu1 %v1847_v22 }
  0x59   :  { %1734 = vmatprep.subr.mxu1 %v2034_v13 }
  0xcd   :  { %v103_v16 = vpop.permute.xlu0 %102 }
  0xce   :  { %vm107_vm1 = vcmp.eq.s32.totalorder %v100_v15, %v103_v16 }
  0xcf   :  { %v1612_v17 = vsel %vm107_vm1, 1.0, %v2034_v13 }
  0xd0   :  { %1715 = vmatprep.mubr.msk.f32.mxu0 %vm117_vm0, %v1612_v17 }
  0xd1   :  { %v106_v18 = vpop.permute.xlu0 %105 }
  0xd2   :  { %vm108_vm2 = vcmp.eq.s32.totalorder %v100_v15, %v106_v18 }
  0xd3   :  { %v1613_v19 = vsel %vm108_vm2, 1.0, %v2034_v13 }
  0xd4   :  { %1716 = vmatmul.mubr.msk.f32.vlgmr.msra.gmra.mrb[0].mxu0 %vm117_vm0, %v1613_v19 }
  0xd5   :  { %1731 = vmatprep.mubr.msk.f32.mxu0 %vm2035_vm3, %v2034_v13 }
 0x1a7   :  { %v1717_v24 = vpop.f32.mrb[0].mxu0 }
 0x1a8   :  { %v190_v25 = vpop.f32.mrb[1].mxu0  ;;  %v2206_v27 = vadd.f32 %v1717_v24, %v199_v23 }
 0x1a9   :  { %v2204_v26 = vadd.f32 %v199_v23, %v190_v25 }
 0x1ab   :  { %1726 = vmatprep.mubr.msk.f32.mxu1 %vm117_vm0, %v2204_v26 }
 0x1ac   :  { %1727 = vmatmul.mubr.msk.f32.vlgmr.msra.gmra.mrb[0].mxu1 %vm117_vm0, %v2206_v27 }
 0x1ad   :  { %1736 = vmatprep.mubr.msk.f32.mxu1 %vm2035_vm3, %v2034_v13 }
 0x27f   :  { %v1728_v29 = vpop.f32.mrb[0].mxu1 }
 0x280   :  { %v285_v30 = vpop.f32.mrb[1].mxu1  ;;  %v2219_v32 = vadd.f32 %v1728_v29, %v1616_v28 }
 0x281   :  { %v2216_v31 = vadd.f32 %v1616_v28, %v285_v30 }
 0x282   :  { %v295_v36 = vmul.f32 0.25, %v2219_v32 }
 0x283   :  { %319 = vrot.lane.b32.xlu1 %v2216_v31, %s2036_s4  ;;  %v294_v34 = vmul.f32 0.25, %v2216_v31 }
 0x287   :  { %398 = vrot.lane.b32.xlu1 %v2219_v32, %s2036_s4 }
 0x2f5   :  { %v320_v33 = vpop.permute.xlu1 %319 }
 0x2f6   :  { %1730 = vmatpush3.xpose.msk.msra.mxu0 %vm321_vm4, %v320_v33 }
 0x2f7   :  { %1739 = vmatprep.subr.mxu0 %v2034_v13 }
 0x2f9   :  { %v399_v35 = vpop.permute.xlu1 %398  ;;  %1732 = vmatmul.mubr.msk.f32.vlgmr.msra.gmra.mrb[2].mxu0 %vm321_vm4, %v294_v34 }
 0x2fa   :  { %1735 = vmatpush3.xpose.msk.msra.mxu1 %vm321_vm4, %v399_v35  ;;  %1741 = vmatprep.mubr.msk.f32.mxu0 %vm2035_vm3, %v2034_v13 }
 0x2fb   :  { %1744 = vmatprep.subr.mxu1 %v2034_v13 }
 0x2fd   :  { %1737 = vmatmul.mubr.msk.f32.vlgmr.msra.gmra.mrb[2].mxu1 %vm321_vm4, %v295_v36 }
 0x2fe   :  { %1746 = vmatprep.mubr.msk.f32.mxu1 %vm2035_vm3, %v2034_v13 }
 0x3cc   :  { %v393_v46 = vpop.f32.mrb[2].mxu0 }
 0x3cd   :  { %v394_v47 = vadd.f32 %v393_v46, %v2246_v44  ;;  %v1733_v48 = vpop.f32.mrb[3].mxu0 }
 0x3cf   :  { %v476_v50 = vsel %vm475_vm5, %v394_v47, -inf }
 0x3d0   :  { %v471_v51 = vpop.f32.mrb[2].mxu1  ;;  %477 = vmax.xlane.f32.xlu0 %v476_v50 }
 0x3d1   :  { %v472_v52 = vadd.f32 %v471_v51, %v2250_v49  ;;  %v1738_v53 = vpop.f32.mrb[3].mxu1  ;;  %v302_v51 = vld [vmem:[%s2410_s6] sm:$0xff] }
 0x3d3   :  { %v479_v54 = vsel %vm475_vm5, %v472_v52, -inf }
 0x3d4   :  { %480 = vmax.xlane.f32.xlu1 %v479_v54 }
 0x3e5   :  { %498 = vrot.lane.b32.xlu1 %v2216_v31, %s2037_s1 }
 0x3e6   :  { %574 = vrot.lane.b32.xlu0 %v2219_v32, %s2037_s1 }
 0x3e9   :  { %652 = vrot.lane.b32.xlu1 %v2216_v31, %s2038_s29 }
 0x3ed   :  { %730 = vrot.lane.b32.xlu1 %v2219_v32, %s2038_s29 }
 0x3f1   :  { %728 = vrot.lane.b32.xlu1 %v295_v36, %s2039_s30 }
 0x45d   :  { %v478_v55 = vpop.xlane.xlu0 %477 }
 0x45e   :  { %v482_v56 = vsub.f32 %v394_v47, %v478_v55 }
 0x460   :  { %v484_v60 = vmul.f32 1.442695, %v482_v56 }
 0x461   :  { %v481_v57 = vpop.xlane.xlu1 %480  ;;  %v575_v58 = vpop.permute.xlu0 %574 }
 0x462   :  { %v483_v59 = vsub.f32 %v472_v52, %v481_v57  ;;  %1745 = vmatpush3.msra.mxu1 %v575_v58  ;;  %v303_v52 = vld [vmem:[%s2410_s6 + $0x8] sm:$0xff] }
 0x463   :  { %1754 = vmatprep.subr.mxu1 %v2034_v13  ;;  %v1855_v53 = vpack.c.bf16 %v303_v52, %v302_v51  ;;  %v2305_v58 = vld [vmem:[#allocation7] sm:$0x7f]  ;;  %v1637_v52 = vld [vmem:[#allocation8] ss:$0 sm:$0xff] }
 0x464   :  { %v486_v61 = vmul.f32 1.442695, %v483_v59  ;;  %v1145_v59 = vrot.slane %v2305_v58, %v2243_v42 }
 0x465   :  { %v499_v62 = vpop.permute.xlu1 %498 }
 0x466   :  { %1911 = vpow2.f32 %v486_v61  ;;  %1740 = vmatpush3.msra.mxu0 %v499_v62 }
 0x467   :  { %1749 = vmatprep.subr.mxu0 %v2034_v13  ;;  %1913 = vpow2.f32 %v484_v60 }
 0x469   :  { %v653_v5 = vpop.permute.xlu1 %652 }
 0x46d   :  { %v731_v7 = vpop.permute.xlu1 %730 }
 0x470   :  { %v1912_v63 = vpop.eup %1911 }
 0x471   :  { %v491_v0 = vsel %vm475_vm5, %v1912_v63, 0.0  ;;  %v1914_v1 = vpop.eup %1913  ;;  %v729_v11 = vpop.permute.xlu1 %728 }
 0x472   :  { %492 = vadd.xlane.f32.xlu0 %v491_v0  ;;  %v488_v2 = vsel %vm475_vm5, %v1914_v1, 0.0 }
 0x476   :  { %489 = vadd.xlane.f32.xlu0 %v488_v2 }
 0x48c   :  { %650 = vrot.lane.b32.xlu0 %v294_v34, %s2039_s30 }
 0x4ff   :  { %v493_v3 = vpop.xlane.xlu0 %492 }
 0x500   :  { %1915 = vrcp.f32 %v493_v3 }
 0x503   :  { %v490_v4 = vpop.xlane.xlu0 %489 }
 0x504   :  { %1917 = vrcp.f32 %v490_v4 }
 0x507   :  { %v651_v12 = vpop.permute.xlu0 %650 }
 0x50a   :  { %v1916_v6 = vpop.eup %1915 }
 0x50b   :  { %v497_v8 = vmul.f32 %v1916_v6, %v1912_v63 }
 0x50d   :  { %1747 = vmatmul.mubr.msk.f32.vlgmr.msra.gmra.mrb[4].mxu1 %vm475_vm5, %v497_v8 }
 0x50e   :  { %v1918_v9 = vpop.eup %1917  ;;  %1755 = vmatpush3.xpose.msk.msra.mxu1 %vm321_vm4, %v731_v7  ;;  %1756 = vmatprep.mubr.msk.f32.mxu1 %vm2035_vm3, %v2034_v13 }
 0x50f   :  { %v495_v10 = vmul.f32 %v1918_v9, %v1914_v1  ;;  %1764 = vmatprep.subr.mxu1 %v2034_v13 }
 0x511   :  { %1742 = vmatmul.mubr.msk.f32.vlgmr.msra.gmra.mrb[4].mxu0 %vm475_vm5, %v495_v10  ;;  %1757 = vmatmul.mubr.msk.f32.vlgmr.msra.gmra.mrb[6].mxu1 %vm321_vm4, %v729_v11 }
 0x512   :  { %1750 = vmatpush3.xpose.msk.msra.mxu0 %vm321_vm4, %v653_v5  ;;  %1751 = vmatprep.mubr.msk.f32.mxu0 %vm2035_vm3, %v2034_v13 }
 0x513   :  { %1759 = vmatprep.subr.mxu0 %v2034_v13  ;;  %1766 = vmatprep.mubr.msk.f32.mxu1 %vm2035_vm3, %v2034_v13 }
 0x515   :  { %1752 = vmatmul.mubr.msk.f32.vlgmr.msra.gmra.mrb[6].mxu0 %vm321_vm4, %v651_v12  ;;  %v1190_v12 = vld [vmem:[%s2412_s8 + $0x8] sm:$0xff] }
 0x516   :  { %1761 = vmatprep.mubr.msk.f32.mxu0 %vm2035_vm3, %v2034_v13 }
 0x5e0   :  { %v646_v14 = vpop.f32.mrb[4].mxu1 }
 0x5e1   :  { %v1748_v15 = vpop.f32.mrb[5].mxu1 }
 0x5e2   :  { %v1191_v15 = vld [vmem:[%s2412_s8 + $0x10] sm:$0xff] }
 0x5e4   :  { %v570_v16 = vpop.f32.mrb[4].mxu0  ;;  %v802_v17 = vpop.f32.mrb[6].mxu1 }
 0x5e5   :  { %v803_v18 = vadd.f32 %v802_v17, %v2250_v49  ;;  %v1743_v19 = vpop.f32.mrb[5].mxu0  ;;  %v1758_v20 = vpop.f32.mrb[7].mxu1  ;;  %v304_v49 = vld [vmem:[%s2410_s6 + $0x10] sm:$0xff] }
 0x5e6   :  { %v1284_v19 = vld [vmem:[%s2414_s10 + $0x8] sm:$0xff]  ;;  %v1285_v20 = vld [vmem:[%s2414_s10 + $0x10] sm:$0xff] }
 0x5e7   :  { %v809_v21 = vsel %vm475_vm5, %v803_v18, -inf }
 0x5e8   :  { %810 = vmax.xlane.f32.xlu1 %v809_v21  ;;  %v724_v22 = vpop.f32.mrb[6].mxu0 }
 0x5e9   :  { %v725_v23 = vadd.f32 %v724_v22, %v2246_v44  ;;  %v1753_v24 = vpop.f32.mrb[7].mxu0  ;;  %v1286_v22 = vld [vmem:[%s2414_s10 + $0x18] sm:$0xff] }
 0x5ea   :  { %v1287_v24 = vld [vmem:[%s2414_s10 + $0x20] sm:$0xff] }
 0x5eb   :  { %v806_v25 = vsel %vm475_vm5, %v725_v23, -inf }
 0x5ec   :  { %807 = vmax.xlane.f32.xlu0 %v806_v25  ;;  %v1288_v25 = vld [vmem:[%s2414_s10 + $0x28] sm:$0xff] }
 0x5f9   :  { %828 = vrot.lane.b32.xlu1 %v2216_v31, %s2040_s15 }
 0x675   :  { %v811_v28 = vpop.xlane.xlu1 %810 }
 0x676   :  { %v813_v29 = vsub.f32 %v803_v18, %v811_v28  ;;  %v1283_v18 = vld [vmem:[%s2414_s10] sm:$0xff]  ;;  %v1875_v28 = vpack.c.bf16 %v1288_v25, %v1287_v24 }
 0x677   :  { %v1867_v21 = vpack.c.bf16 %v1284_v19, %v1283_v18  ;;  %v1437_v19 = vld [vmem:[%s2415_s11 + $0x18] sm:$0xff] }
 0x678   :  { %v816_v30 = vmul.f32 1.442695, %v813_v29 }
 0x679   :  { %v829_v33 = vpop.permute.xlu1 %828  ;;  %v808_v34 = vpop.xlane.xlu0 %807 }
 0x67a   :  { %1919 = vpow2.f32 %v816_v30  ;;  %v812_v35 = vsub.f32 %v725_v23, %v808_v34  ;;  %1760 = vmatpush3.msra.mxu0 %v829_v33  ;;  %v1871_v23 = vpack.c.bf16 %v1286_v22, %v1285_v20 }
 0x67c   :  { %v814_v36 = vmul.f32 1.442695, %v812_v35 }
 0x67e   :  { %1921 = vpow2.f32 %v814_v36 }
 0x684   :  { %v1920_v37 = vpop.eup %1919 }
 0x685   :  { %v821_v39 = vsel %vm475_vm5, %v1920_v37, 0.0 }
 0x686   :  { %822 = vadd.xlane.f32.xlu0 %v821_v39  ;;  %v1185_v39 = vsub.s32 2, %v2237_v38 }
 0x688   :  { %v1922_v40 = vpop.eup %1921 }
 0x689   :  { %v818_v41 = vsel %vm475_vm5, %v1922_v40, 0.0 }
 0x68a   :  { %819 = vadd.xlane.f32.xlu0 %v818_v41 }
 0x6a0   :  { %904 = vrot.lane.b32.xlu0 %v2219_v32, %s2040_s15  ;;  %v305_v32 = vld [vmem:[%s2410_s6 + $0x18] sm:$0xff] }
 0x6a1   :  { %v1851_v50 = vpack.c.bf16 %v305_v32, %v304_v49  ;;  %v1289_v32 = vld [vmem:[%s2414_s10 + $0x30] sm:$0xff] }
 0x6a3   :  { %1852 = vmatprep.subr.bf16.mxu0 %v1851_v50 }
 0x713   :  { %v823_v31 = vpop.xlane.xlu0 %822 }
 0x714   :  { %1923 = vrcp.f32 %v823_v31 }
 0x717   :  { %v820_v43 = vpop.xlane.xlu0 %819 }
 0x718   :  { %1925 = vrcp.f32 %v820_v43 }
 0x71b   :  { %v905_v44 = vpop.permute.xlu0 %904 }
 0x71c   :  { %1765 = vmatpush3.msra.mxu1 %v905_v44 }
 0x71e   :  { %v1924_v45 = vpop.eup %1923 }
 0x71f   :  { %v827_v46 = vmul.f32 %v1924_v45, %v1920_v37  ;;  %v1179_v37 = vsub.s32 1, %v2237_v38  ;;  %v1186_v45 = vrot.slane %v2305_v58, %v1185_v39 }
 0x721   :  { %1767 = vmatmul.mubr.msk.f32.vlgmr.msra.gmra.mrb[8].mxu1 %vm475_vm5, %v827_v46 }
 0x722   :  { %v1926_v47 = vpop.eup %1925 }
 0x723   :  { %v825_v48 = vmul.f32 %v1926_v47, %v1922_v40  ;;  %v1180_v40 = vrot.slane %v2305_v58, %v1179_v37 }
 0x725   :  { %1762 = vmatmul.mubr.msk.f32.vlgmr.msra.gmra.mrb[8].mxu0 %vm475_vm5, %v825_v48 }
 0x726   :  { %1854 = vmatpush3.bf16.msra.mxu0 %v1851_v50  ;;  %v1290_v50 = vld [vmem:[%s2414_s10 + $0x38] sm:$0xff] }
 0x727   :  { %1856 = vmatprep.subr.bf16.mxu0 %v1855_v53  ;;  %v1879_v51 = vpack.c.bf16 %v1290_v50, %v1289_v32 }
 0x7f4   :  { %v976_v54 = vpop.f32.mrb[8].mxu1 }
 0x7f5   :  { %v1768_v55 = vpop.f32.mrb[9].mxu1 }
 0x7f8   :  { %v900_v56 = vpop.f32.mrb[8].mxu0 }
 0x7f9   :  { %v1763_v57 = vpop.f32.mrb[9].mxu0  ;;  %1773 = vmatprep.mubr.msk.f32.mxu0 %vm321_vm4, %v900_v56 }
 0x7fa   :  { %1774 = vmatmul.mubr.msk.f32.vlgmr.msra.gmra.mrb[10].mxu0 %vm321_vm4, %v976_v54 }
 0x7fb   :  { %1858 = vmatpush3.bf16.msra.mxu0 %v1855_v53  ;;  %1780 = vmatprep.mubr.msk.f32.mxu0 %vm321_vm4, %v570_v16  ;;  %v1192_v16 = vld [vmem:[%s2412_s8 + $0x18] sm:$0xff] }
 0x7fc   :  { %v1863_v17 = vpack.c.bf16 %v1192_v16, %v1191_v15  ;;  %1868 = vmatprep.subr.bf16.mxu0 %v1867_v21  ;;  %v1435_v15 = vld [vmem:[%s2415_s11 + $0x8] sm:$0xff]  ;;  %v1436_v16 = vld [vmem:[%s2415_s11 + $0x10] sm:$0xff] }
 0x7fd   :  { %v1887_v20 = vpack.c.bf16 %v1437_v19, %v1436_v16 }
 0x802   :  { %1781 = vmatmul.mubr.msk.f32.vlgmr.msra.gmra.mrb[10].mxu0 %vm321_vm4, %v646_v14 }
 0x803   :  { %1870 = vmatpush3.bf16.msra.mxu0 %v1867_v21 }
 0x804   :  { %1872 = vmatprep.subr.bf16.mxu0 %v1871_v23 }
 0x807   :  { %1874 = vmatpush3.bf16.msra.mxu0 %v1871_v23 }
 0x808   :  { %1876 = vmatprep.subr.bf16.mxu0 %v1875_v28 }
 0x80b   :  { %1878 = vmatpush3.bf16.msra.mxu0 %v1875_v28 }
 0x80c   :  { %1880 = vmatprep.subr.bf16.mxu0 %v1879_v51 }
 0x80f   :  { %1882 = vmatpush3.bf16.msra.mxu0 %v1879_v51 }
 0x8d5   :  { %v1782_v60 = vpop.f32.mrb[10].mxu0 }
 0x8d6   :  { %v1147_v61 = vadd.f32 %v1782_v60, %v1145_v59  ;;  %v1133_v62 = vpop.f32.mrb[11].mxu0  ;;  %v1293_v60 = vsub.s32 3, %v2237_v38 }
 0x8d7   :  { %v1146_v63 = vadd.f32 %v1145_v59, %v1133_v62 }
 0x8d8   :  { %v1149_v0 = vadd.f32 %v1147_v61, %v2206_v27  ;;  %v1294_v61 = vrot.slane %v2305_v58, %v1293_v60 }
 0x8d9   :  { %v1148_v1 = vadd.f32 %v1146_v63, %v2204_v26  ;;  %v1189_v26 = vld [vmem:[%s2412_s8] sm:$0xff] }
 0x8da   :  { %v1153_v2 = vsel %vm117_vm0, %v1149_v0, 0.0  ;;  %v1859_v14 = vpack.c.bf16 %v1190_v12, %v1189_v26 }
 0x8db   :  { %1154 = vadd.xlane.f32.xlu0 %v1153_v2  ;;  %v1150_v3 = vsel %vm117_vm0, %v1148_v1, 0.0 }
 0x8dc   :  { %1151 = vadd.xlane.f32.xlu1 %v1150_v3  ;;  %1860 = vmatprep.subr.bf16.mxu1 %v1859_v14 }
 0x8dd   :  { %1862 = vmatpush3.bf16.msra.mxu1 %v1859_v14  ;;  %v1434_v14 = vld [vmem:[%s2415_s11] sm:$0xff] }
 0x8de   :  { %1864 = vmatprep.subr.bf16.mxu1 %v1863_v17  ;;  %v1884_v18 = vpack.c.bf16 %v1435_v15, %v1434_v14 }
 0x8e1   :  { %1866 = vmatpush3.bf16.msra.mxu1 %v1863_v17  ;;  %v2041_v17 = vmov 0.0|0.0  }
 0x8e2   :  { %1883 = vmatprep.subr.bf16.mxu1 %v2041_v17 }
 0x968   :  { %v1155_v4 = vpop.xlane.xlu0 %1154 }
 0x969   :  { %v1158_v5 = vmul.f32 0.03125, %v1155_v4  ;;  %v1152_v6 = vpop.xlane.xlu1 %1151 }
 0x96a   :  { %v1157_v7 = vmul.f32 0.03125, %v1152_v6 }
 0x96b   :  { %v1160_v8 = vsub.f32 %v1149_v0, %v1158_v5 }
 0x96c   :  { %v1159_v42 = vsub.f32 %v1148_v1, %v1157_v7 }
 0x96d   :  { %v1162_v9 = vmul.f32 %v1160_v8, %v1160_v8 }
 0x96e   :  { %v1161_v10 = vmul.f32 %v1159_v42, %v1159_v42 }
 0x96f   :  { %v1166_v11 = vsel %vm117_vm0, %v1162_v9, 0.0 }
 0x970   :  { %1167 = vadd.xlane.f32.xlu0 %v1166_v11  ;;  %v1163_v27 = vsel %vm117_vm0, %v1161_v10, 0.0 }
 0x971   :  { %1164 = vadd.xlane.f32.xlu1 %v1163_v27 }
 0x9fd   :  { %v1168_v29 = vpop.xlane.xlu0 %1167 }
 0x9fe   :  { %v1170_v30 = vmul.f32 0.03125, %v1168_v29  ;;  %v1165_v33 = vpop.xlane.xlu1 %1164  ;;  %v1407_v29 = vsub.s32 4, %v2237_v38 }
 0x9ff   :  { %v1169_v34 = vmul.f32 0.03125, %v1165_v33 }
 0xa00   :  { %v1172_v35 = vadd.f32 1e-05, %v1170_v30  ;;  %v1413_v30 = vsub.s32 5, %v2237_v38  ;;  %v1408_v33 = vrot.slane %v2305_v58, %v1407_v29 }
 0xa01   :  { %v1171_v36 = vadd.f32 1e-05, %v1169_v34 }
 0xa02   :  { %1927 = vrsqrt.f32 %v1172_v35 }
 0xa03   :  { %1929 = vrsqrt.f32 %v1171_v36  ;;  %v1414_v36 = vrot.slane %v2305_v58, %v1413_v30 }
 0xa0c   :  { %v1928_v41 = vpop.eup %1927 }
 0xa0d   :  { %v1930_v31 = vpop.eup %1929  ;;  %v1176_v43 = vmul.f32 %v1928_v41, %v1160_v8 }
 0xa0e   :  { %v1175_v44 = vmul.f32 %v1930_v31, %v1159_v42 }
 0xa0f   :  { %v1182_v46 = vmul.f32 %v1180_v40, %v1176_v43 }
 0xa10   :  { %v1181_v47 = vmul.f32 %v1180_v40, %v1175_v44 }
 0xa11   :  { %v1188_v49 = vadd.f32 %v1186_v45, %v1182_v46 }
 0xa12   :  { %v1187_v48 = vadd.f32 %v1186_v45, %v1181_v47 }
 0xa14   :  { %1791 = vmatprep.mubr.msk.f32.mxu1 %vm117_vm0, %v1187_v48 }
 0xa15   :  { %1792 = vmatmul.mubr.msk.f32.vlgmr.msra.gmra.mrb[10].mxu1 %vm117_vm0, %v1188_v49 }
 0xa16   :  { %1821 = vmatprep.mubr.msk.f32.mxu1 %vm2035_vm3, %v2034_v13  ;;  %1885 = vmatpush3.bf16.msra.mxu1 %v1884_v18 }
 0xa17   :  { %1886 = vmatprep.subr.bf16.mxu1 %v2041_v17 }
 0xa1a   :  { %1888 = vmatpush3.bf16.msra.mxu1 %v1887_v20 }
 0xa1b   :  { %1889 = vmatprep.subr.bf16.mxu1 %v2041_v17 }
 0xae8   :  { %v1793_v53 = vpop.f32.mrb[10].mxu1 }
 0xae9   :  { %v1278_v54 = vadd.f32 %v1793_v53, %v1637_v52  ;;  %v1272_v55 = vpop.f32.mrb[11].mxu1 }
 0xaea   :  { %v1273_v56 = vadd.f32 %v1637_v52, %v1272_v55 }
 0xaeb   :  { %v1282_v59 = vmax.f32 %v1278_v54, 0.0 }
 0xaec   :  { %v1281_v57 = vmax.f32 %v1273_v56, 0.0  ;;  %v1519_v56 = vld [vmem:[%s2416_s12] sm:$0xff] }
 0xaee   :  { %1810 = vmatprep.mubr.msk.f32.mxu0 %vm1295_vm6, %v1281_v57  ;;  %v1520_v57 = vld [vmem:[%s2416_s12 + $0x8] sm:$0xff] }
 0xaef   :  { %1811 = vmatmul.mubr.msk.f32.vlgmr.msra.gmra.mrb[12].mxu0 %vm1295_vm6, %v1282_v59 }
 0xbc2   :  { %v1812_v62 = vpop.f32.mrb[12].mxu0 }
 0xbc3   :  { %v1374_v63 = vadd.f32 %v1812_v62, %v1294_v61  ;;  %v1368_v0 = vpop.f32.mrb[13].mxu0  ;;  %v1890_v62 = vpack.c.bf16 %v1520_v57, %v1519_v56 }
 0xbc4   :  { %v1369_v1 = vadd.f32 %v1368_v0, %v1294_v61  ;;  %v1521_v0 = vld [vmem:[%s2416_s12 + $0x10] sm:$0xff] }
 0xbc5   :  { %v1378_v2 = vadd.f32 %v1374_v63, %v1188_v49 }
 0xbc6   :  { %v1377_v3 = vadd.f32 %v1369_v1, %v1187_v48  ;;  %v1522_v1 = vld [vmem:[%s2416_s12 + $0x18] sm:$0xff] }
 0xbc7   :  { %v1382_v4 = vsel %vm117_vm0, %v1378_v2, 0.0 }
 0xbc8   :  { %1383 = vadd.xlane.f32.xlu0 %v1382_v4  ;;  %v1379_v5 = vsel %vm117_vm0, %v1377_v3, 0.0 }
 0xbc9   :  { %1380 = vadd.xlane.f32.xlu1 %v1379_v5 }
 0xc55   :  { %v1384_v6 = vpop.xlane.xlu0 %1383 }
 0xc56   :  { %v1386_v7 = vmul.f32 0.03125, %v1384_v6  ;;  %v1381_v8 = vpop.xlane.xlu1 %1380 }
 0xc57   :  { %v1385_v42 = vmul.f32 0.03125, %v1381_v8 }
 0xc58   :  { %v1388_v9 = vsub.f32 %v1378_v2, %v1386_v7  ;;  %v1893_v2 = vpack.c.bf16 %v1522_v1, %v1521_v0 }
 0xc59   :  { %v1387_v10 = vsub.f32 %v1377_v3, %v1385_v42  ;;  %v1440_v3 = vsub.s32 6, %v2237_v38 }
 0xc5a   :  { %v1390_v11 = vmul.f32 %v1388_v9, %v1388_v9 }
 0xc5b   :  { %v1389_v27 = vmul.f32 %v1387_v10, %v1387_v10  ;;  %v1441_v4 = vrot.slane %v2305_v58, %v1440_v3 }
 0xc5c   :  { %v1394_v26 = vsel %vm117_vm0, %v1390_v11, 0.0 }
 0xc5d   :  { %1395 = vadd.xlane.f32.xlu0 %v1394_v26  ;;  %v1391_v12 = vsel %vm117_vm0, %v1389_v27, 0.0 }
 0xc5e   :  { %1392 = vadd.xlane.f32.xlu1 %v1391_v12 }
 0xcea   :  { %v1396_v21 = vpop.xlane.xlu0 %1395 }
 0xceb   :  { %v1398_v22 = vmul.f32 0.03125, %v1396_v21  ;;  %v1393_v23 = vpop.xlane.xlu1 %1392 }
 0xcec   :  { %v1397_v24 = vmul.f32 0.03125, %v1393_v23 }
 0xced   :  { %v1400_v25 = vadd.f32 1e-05, %v1398_v22 }
 0xcee   :  { %v1399_v28 = vadd.f32 1e-05, %v1397_v24 }
 0xcef   :  { %1931 = vrsqrt.f32 %v1400_v25 }
 0xcf0   :  { %1933 = vrsqrt.f32 %v1399_v28 }
 0xcf9   :  { %v1932_v34 = vpop.eup %1931 }
 0xcfa   :  { %v1934_v35 = vpop.eup %1933  ;;  %v1404_v37 = vmul.f32 %v1932_v34, %v1388_v9 }
 0xcfb   :  { %v1403_v39 = vmul.f32 %v1934_v35, %v1387_v10 }
 0xcfc   :  { %v1410_v40 = vmul.f32 %v1408_v33, %v1404_v37 }
 0xcfd   :  { %v1409_v41 = vmul.f32 %v1408_v33, %v1403_v39 }
 0xcfe   :  { %v1416_v31 = vadd.f32 %v1414_v36, %v1410_v40 }
 0xcff   :  { %v1415_v43 = vadd.f32 %v1414_v36, %v1409_v41 }
 0xd00   :  { %v1424_v44 = vsel %vm117_vm0, %v1416_v31, 0.0 }
 0xd01   :  { %v1417_v45 = vsel %vm117_vm0, %v1415_v43, 0.0  ;;  %v1425_v46 = vrot.slane %v1424_v44, 4 }
 0xd02   :  { %v1418_v47 = vrot.slane %v1417_v45, 4 }
 0xd03   :  { %v1426_v48 = vadd.f32 %v1425_v46, %v1424_v44 }
 0xd04   :  { %v1419_v49 = vadd.f32 %v1418_v47, %v1417_v45 }
 0xd05   :  { %v1427_v32 = vrot.slane %v1426_v48, 2 }
 0xd06   :  { %v1420_v50 = vrot.slane %v1419_v49, 2 }
 0xd07   :  { %v1428_v51 = vadd.f32 %v1427_v32, %v1426_v48 }
 0xd08   :  { %v1421_v52 = vadd.f32 %v1420_v50, %v1419_v49 }
 0xd09   :  { %v1429_v53 = vrot.slane %v1428_v51, 1 }
 0xd0a   :  { %v1422_v54 = vrot.slane %v1421_v52, 1 }
 0xd0b   :  { %v1430_v55 = vadd.f32 %v1429_v53, %v1428_v51 }
 0xd0c   :  { %v1423_v59 = vadd.f32 %v1422_v54, %v1421_v52 }
 0xd0d   :  { %v1433_v60 = vmul.f32 0.125, %v1430_v55 }
 0xd0e   :  { %v1432_v61 = vmul.f32 0.125, %v1423_v59 }
 0xd10   :  { %v1445_v63 = vsel %vm1444_vm7, %v1433_v60, %v1432_v61 }
 0xd11   :  { %1822 = vmatmul.mubr.msk.f32.vlgmr.msra.gmra.mrb[12].mxu1 %vm117_vm0, %v1445_v63 }
 0xd12   :  { %1891 = vmatpush3.bf16.msra.mxu1 %v1890_v62  ;;  %1832 = vmatprep.mubr.msk.f32.mxu1 %vm2035_vm3, %v2034_v13  ;;  %v1643_v13 = vld [vmem:[#allocation2] ss:$0 sm:$0xff] }
 0xd13   :  { %1892 = vmatprep.subr.bf16.mxu1 %v2041_v17 }
 0xd16   :  { %1894 = vmatpush3.bf16.msra.mxu1 %v1893_v2 }
 0xde4   :  { %v1514_v5 = vpop.f32.mrb[12].mxu1 }
 0xde5   :  { %v1515_v6 = vadd.f32 %v1514_v5, %v1441_v4  ;;  %v1823_v7 = vpop.f32.mrb[13].mxu1 }
 0xde7   :  { %v1518_v8 = vmax.f32 %v1515_v6, 0.0 }
 0xde9   :  { %1833 = vmatmul.mubr.msk.f32.vlgmr.msra.gmra.mrb[14].mxu1 %vm117_vm0, %v1518_v8 }
 0xebc   :  { %v1599_v42 = vpop.f32.mrb[14].mxu1 }
 0xebd   :  { %v1600_v9 = vadd.f32 %v1643_v13, %v1599_v42  ;;  %v1834_v10 = vpop.f32.mrb[15].mxu1 }
 0xebf   :  { %1604 = vst.msk [vmem:[%s2418_s14] sm:$0x3] %vm1603_vm8, %v1600_v9 }
 0xec0   :  { %1609 = vsyncpa [#allocation4], 1 }
 0xec1   :  { %1610 = vsyncpa [#allocation6], 1 }
 0xec2   :  { %1611 = vsyncpa [#allocation9], 1 }

</bundles_post_ra>
